<compile_context>
chip_gen: v6e
topology: v6e:2x2x1
jax: 0.10.0
libtpu: 0.0.40
codegen_flags: <defaults>
</compile_context>

<pallas_src>
import jax
import jax.numpy as jnp
from jax.experimental import pallas as pl
from jax.experimental.pallas import tpu as pltpu


def _round_up(x, m):
    return (x + m - 1) // m * m


def vae_encoder_kernel(x_ref, eps_ref, w1_ref, b1_ref, w2_ref, b2_ref,
                       mu_ref, logvar_ref, z_ref):
    w_dtype = w1_ref.dtype
    x = x_ref[...].astype(w_dtype)

    # h1 = relu(x @ W1 + b1)     (bf16 x bf16 -> f32 accumulate on the MXU)
    h1 = jnp.dot(x, w1_ref[...], preferred_element_type=jnp.float32) + b1_ref[...]
    h1 = jnp.maximum(h1, 0.0)

    # Fused second layer: [mu | log_var] = h1 @ [Wmu | Wvar] + [bmu | bvar]
    y2 = jnp.dot(h1.astype(w_dtype), w2_ref[...],
                 preferred_element_type=jnp.float32) + b2_ref[...]
    D = mu_ref.shape[-1]
    mu = y2[:, :D]
    log_var = y2[:, D:]

    # reparameterize: z = eps * exp(0.5 * log_var) + mu   (exp -> EUP slot)
    std = jnp.exp(0.5 * log_var)
    z = eps_ref[...] * std + mu

    mu_ref[...] = mu.astype(mu_ref.dtype)
    logvar_ref[...] = log_var.astype(logvar_ref.dtype)
    z_ref[...] = z.astype(z_ref.dtype)


def vae_encoder(x, params, eps, *, tm=128):
    """x: [B, D] f32, eps: [B, D] f32.  Weights are [in, out] (torch W^T)."""
    B, D = x.shape
    w1, b1 = params["w1"], params["b1"]
    # Fuse the two output heads along the out axis once, outside the kernel.
    w2 = jnp.concatenate([params["w_mu"], params["w_var"]], axis=1)   # [D, 2D]
    b2 = jnp.concatenate([params["b_mu"], params["b_var"]], axis=1)   # [1, 2D]

    # Batch tile: multiple of 8 (sublane); pad B so the grid divides evenly.
    tm = min(tm, _round_up(B, 8))
    Bp = _round_up(B, tm)
    if Bp != B:
        pad = Bp - B
        x = jnp.pad(x, ((0, pad), (0, 0)))
        eps = jnp.pad(eps, ((0, pad), (0, 0)))
    grid = (Bp // tm,)

    row_spec = pl.BlockSpec((tm, D), lambda i: (i, 0))

    def resident(arr):
        # Full-array block, constant index -> loaded once, stays in VMEM.
        return pl.BlockSpec(arr.shape, lambda i: (0, 0))

    out_sd = jax.ShapeDtypeStruct((Bp, D), jnp.float32)

    weight_bytes = (w1.size * w1.dtype.itemsize + w2.size * w2.dtype.itemsize
                    + b1.size * b1.dtype.itemsize + b2.size * b2.dtype.itemsize)
    act_bytes = 5 * Bp * D * 4                      # x, eps, mu, log_var, z
    cost = pl.CostEstimate(
        flops=2 * Bp * D * D + 2 * Bp * D * (2 * D),
        transcendentals=Bp * D,
        bytes_accessed=weight_bytes + act_bytes,
    )

    # Weights + double-buffered activation tiles, with headroom.
    vmem_needed = weight_bytes + 2 * (5 * tm * D * 4) + (tm * 2 * D * 4)
    vmem_limit = min(100 * 1024 * 1024, max(32 * 1024 * 1024, 2 * vmem_needed))

    mu, log_var, z = pl.pallas_call(
        vae_encoder_kernel,
        grid=grid,
        in_specs=[row_spec,            # x tile
                  row_spec,            # eps tile
                  resident(w1),        # w1   [D, D]   bf16
                  resident(b1),        # b1   [1, D]   f32
                  resident(w2),        # w2   [D, 2D]  bf16 (fused mu|var)
                  resident(b2)],       # b2   [1, 2D]  f32
        out_specs=(row_spec, row_spec, row_spec),
        out_shape=(out_sd, out_sd, out_sd),
        compiler_params=pltpu.CompilerParams(
            dimension_semantics=("parallel",),
            vmem_limit_bytes=vmem_limit,
        ),
        cost_estimate=cost,
    )(x, eps, w1, b1, w2, b2)

    if Bp != B:
        mu, log_var, z = mu[:B], log_var[:B], z[:B]
    return mu, log_var, z


def init_params(key, embed_dim, weight_dtype=jnp.bfloat16):
    ks = jax.random.split(key, 6)
    scale = 0.02
    rnd = lambda k, shape: (scale * jax.random.normal(k, shape, jnp.float32))
    return {
        # stored as [in, out] (i.e. PyTorch weight transposed), bf16 weights
        "w1":    rnd(ks[0], (embed_dim, embed_dim)).astype(weight_dtype),
        "b1":    rnd(ks[1], (1, embed_dim)),
        "w_mu":  rnd(ks[2], (embed_dim, embed_dim)).astype(weight_dtype),
        "b_mu":  rnd(ks[3], (1, embed_dim)),
        "w_var": rnd(ks[4], (embed_dim, embed_dim)).astype(weight_dtype),
        "b_var": rnd(ks[5], (1, embed_dim)),
    }


def reference(x, params, eps):
    """Pure-JAX reference with the same bf16-weight / f32-accumulate numerics."""
    wd = params["w1"].dtype
    h1 = jnp.maximum(
        jnp.dot(x.astype(wd), params["w1"],
                preferred_element_type=jnp.float32) + params["b1"], 0.0)
    h1c = h1.astype(wd)
    mu = jnp.dot(h1c, params["w_mu"],
                 preferred_element_type=jnp.float32) + params["b_mu"]
    log_var = jnp.dot(h1c, params["w_var"],
                      preferred_element_type=jnp.float32) + params["b_var"]
    z = eps * jnp.exp(0.5 * log_var) + mu
    return mu, log_var, z


if __name__ == "__main__":
    batch, embed_dim = 16, 128

    key = jax.random.PRNGKey(0)
    k_param, k_x, k_eps = jax.random.split(key, 3)

    params = init_params(k_param, embed_dim)
    x = jax.random.normal(k_x, (batch, embed_dim), jnp.float32)
    eps = jax.random.normal(k_eps, (batch, embed_dim), jnp.float32)

    # tm=8 -> grid of 2 batch steps to exercise pipelining / parallel semantics.
    mu, log_var, z = vae_encoder(x, params, eps, tm=8)
    jax.block_until_ready((mu, log_var, z))

    mu_ref, lv_ref, z_ref = reference(x, params, eps)
    assert jnp.allclose(mu, mu_ref, atol=1e-2, rtol=1e-2), "mu mismatch"
    assert jnp.allclose(log_var, lv_ref, atol=1e-2, rtol=1e-2), "log_var mismatch"
    assert jnp.allclose(z, z_ref, atol=1e-2, rtol=1e-2), "z mismatch"

    print("KERNEL_OK")
</pallas_src>

<mosaic_0001>
module attributes {stable_mosaic.version = 11 : i64} {
  func.func @vae_encoder_kernel(%arg0: i32, %arg1: memref<8x128xf32, #tpu.memory_space<vmem>>, %arg2: memref<8x128xf32, #tpu.memory_space<vmem>>, %arg3: memref<128x128xbf16, #tpu.memory_space<vmem>>, %arg4: memref<1x128xf32, #tpu.memory_space<vmem>>, %arg5: memref<128x256xbf16, #tpu.memory_space<vmem>>, %arg6: memref<1x256xf32, #tpu.memory_space<vmem>>, %arg7: memref<8x128xf32, #tpu.memory_space<vmem>>, %arg8: memref<8x128xf32, #tpu.memory_space<vmem>>, %arg9: memref<8x128xf32, #tpu.memory_space<vmem>>) attributes {dimension_semantics = [#tpu.dimension_semantics<parallel>], iteration_bounds = array<i64: 2>, scalar_prefetch = 0 : i64, scratch_operands = 0 : i64, tpu.core_type = #tpu.core_type<tc>, window_params = [{transform_indices = @transform_0, window_bounds = array<i64: 8, 128>}, {transform_indices = @transform_1, window_bounds = array<i64: 8, 128>}, {pipeline_mode = #tpu.pipeline_mode<synchronous>, transform_indices = @transform_2, window_bounds = array<i64: 128, 128>}, {pipeline_mode = #tpu.pipeline_mode<synchronous>, transform_indices = @transform_3, window_bounds = array<i64: 1, 128>}, {pipeline_mode = #tpu.pipeline_mode<synchronous>, transform_indices = @transform_4, window_bounds = array<i64: 128, 256>}, {pipeline_mode = #tpu.pipeline_mode<synchronous>, transform_indices = @transform_5, window_bounds = array<i64: 1, 256>}, {transform_indices = @transform_6, window_bounds = array<i64: 8, 128>}, {transform_indices = @transform_7, window_bounds = array<i64: 8, 128>}, {transform_indices = @transform_8, window_bounds = array<i64: 8, 128>}]} {
    %c0 = arith.constant 0 : index
    %c0_0 = arith.constant 0 : index
    %0 = vector.load %arg1[%c0, %c0_0] : memref<8x128xf32, #tpu.memory_space<vmem>>, vector<8x128xf32>
    %1 = arith.truncf %0 : vector<8x128xf32> to vector<8x128xbf16>
    %c0_1 = arith.constant 0 : index
    %c0_2 = arith.constant 0 : index
    %2 = vector.load %arg3[%c0_1, %c0_2] : memref<128x128xbf16, #tpu.memory_space<vmem>>, vector<128x128xbf16>
    %cst = arith.constant dense<0.000000e+00> : vector<8x128xf32>
    %3 = tpu.matmul %1, %2, %cst {dimension_numbers = #tpu.dot_dimension_numbers<[1], [0], [0], [1], [0, 0, 1, 1], [], []>} : vector<8x128xbf16>, vector<128x128xbf16>, vector<8x128xf32> -> vector<8x128xf32>
    %c0_3 = arith.constant 0 : index
    %c0_4 = arith.constant 0 : index
    %4 = vector.load %arg4[%c0_3, %c0_4] : memref<1x128xf32, #tpu.memory_space<vmem>>, vector<1x128xf32>
    %5 = vector.broadcast %4 : vector<1x128xf32> to vector<8x128xf32>
    %6 = arith.addf %3, %5 : vector<8x128xf32>
    %cst_5 = arith.constant 0.000000e+00 : f32
    %7 = vector.broadcast %cst_5 : f32 to vector<8x128xf32>
    %8 = arith.maximumf %6, %7 : vector<8x128xf32>
    %9 = arith.truncf %8 : vector<8x128xf32> to vector<8x128xbf16>
    %c0_6 = arith.constant 0 : index
    %c0_7 = arith.constant 0 : index
    %10 = vector.load %arg5[%c0_6, %c0_7] : memref<128x256xbf16, #tpu.memory_space<vmem>>, vector<128x256xbf16>
    %cst_8 = arith.constant dense<0.000000e+00> : vector<8x256xf32>
    %11 = tpu.matmul %9, %10, %cst_8 {dimension_numbers = #tpu.dot_dimension_numbers<[1], [0], [0], [1], [0, 0, 1, 1], [], []>} : vector<8x128xbf16>, vector<128x256xbf16>, vector<8x256xf32> -> vector<8x256xf32>
    %c0_9 = arith.constant 0 : index
    %c0_10 = arith.constant 0 : index
    %12 = vector.load %arg6[%c0_9, %c0_10] : memref<1x256xf32, #tpu.memory_space<vmem>>, vector<1x256xf32>
    %13 = vector.broadcast %12 : vector<1x256xf32> to vector<8x256xf32>
    %14 = arith.addf %11, %13 : vector<8x256xf32>
    %15 = vector.extract_strided_slice %14 {offsets = [0, 0], sizes = [8, 128], strides = [1, 1]} : vector<8x256xf32> to vector<8x128xf32>
    %16 = vector.extract_strided_slice %14 {offsets = [0, 128], sizes = [8, 128], strides = [1, 1]} : vector<8x256xf32> to vector<8x128xf32>
    %cst_11 = arith.constant 5.000000e-01 : f32
    %17 = vector.broadcast %cst_11 : f32 to vector<8x128xf32>
    %18 = arith.mulf %17, %16 : vector<8x128xf32>
    %19 = math.exp %18 : vector<8x128xf32>
    %c0_12 = arith.constant 0 : index
    %c0_13 = arith.constant 0 : index
    %20 = vector.load %arg2[%c0_12, %c0_13] : memref<8x128xf32, #tpu.memory_space<vmem>>, vector<8x128xf32>
    %21 = arith.mulf %20, %19 : vector<8x128xf32>
    %22 = arith.addf %21, %15 : vector<8x128xf32>
    %c0_14 = arith.constant 0 : index
    %c0_15 = arith.constant 0 : index
    %23 = vector.load %arg7[%c0_14, %c0_15] : memref<8x128xf32, #tpu.memory_space<vmem>>, vector<8x128xf32>
    tpu.vector_store %arg7[%c0_14, %c0_15], %15 {strides = array<i32>} : memref<8x128xf32, #tpu.memory_space<vmem>>, vector<8x128xf32>,
    %c0_16 = arith.constant 0 : index
    %c0_17 = arith.constant 0 : index
    %24 = vector.load %arg8[%c0_16, %c0_17] : memref<8x128xf32, #tpu.memory_space<vmem>>, vector<8x128xf32>
    tpu.vector_store %arg8[%c0_16, %c0_17], %16 {strides = array<i32>} : memref<8x128xf32, #tpu.memory_space<vmem>>, vector<8x128xf32>,
    %c0_18 = arith.constant 0 : index
    %c0_19 = arith.constant 0 : index
    %25 = vector.load %arg9[%c0_18, %c0_19] : memref<8x128xf32, #tpu.memory_space<vmem>>, vector<8x128xf32>
    tpu.vector_store %arg9[%c0_18, %c0_19], %22 {strides = array<i32>} : memref<8x128xf32, #tpu.memory_space<vmem>>, vector<8x128xf32>,
    return
  }
  func.func @transform_0(%arg0: i32) -> (i32, i32) {
    %c0_i32 = arith.constant 0 : i32
    %c0_i32_0 = arith.constant 0 : i32
    return %arg0, %c0_i32 : i32, i32
  }
  func.func @transform_1(%arg0: i32) -> (i32, i32) {
    %c0_i32 = arith.constant 0 : i32
    %c0_i32_0 = arith.constant 0 : i32
    return %arg0, %c0_i32 : i32, i32
  }
  func.func @transform_2(%arg0: i32) -> (i32, i32) {
    %c0_i32 = arith.constant 0 : i32
    %c0_i32_0 = arith.constant 0 : i32
    %c0_i32_1 = arith.constant 0 : i32
    return %c0_i32, %c0_i32_0 : i32, i32
  }
  func.func @transform_3(%arg0: i32) -> (i32, i32) {
    %c0_i32 = arith.constant 0 : i32
    %c0_i32_0 = arith.constant 0 : i32
    %c0_i32_1 = arith.constant 0 : i32
    return %c0_i32, %c0_i32_0 : i32, i32
  }
  func.func @transform_4(%arg0: i32) -> (i32, i32) {
    %c0_i32 = arith.constant 0 : i32
    %c0_i32_0 = arith.constant 0 : i32
    %c0_i32_1 = arith.constant 0 : i32
    return %c0_i32, %c0_i32_0 : i32, i32
  }
  func.func @transform_5(%arg0: i32) -> (i32, i32) {
    %c0_i32 = arith.constant 0 : i32
    %c0_i32_0 = arith.constant 0 : i32
    %c0_i32_1 = arith.constant 0 : i32
    return %c0_i32, %c0_i32_0 : i32, i32
  }
  func.func @transform_6(%arg0: i32) -> (i32, i32) {
    %c0_i32 = arith.constant 0 : i32
    %c0_i32_0 = arith.constant 0 : i32
    return %arg0, %c0_i32 : i32, i32
  }
  func.func @transform_7(%arg0: i32) -> (i32, i32) {
    %c0_i32 = arith.constant 0 : i32
    %c0_i32_0 = arith.constant 0 : i32
    return %arg0, %c0_i32 : i32, i32
  }
  func.func @transform_8(%arg0: i32) -> (i32, i32) {
    %c0_i32 = arith.constant 0 : i32
    %c0_i32_0 = arith.constant 0 : i32
    return %arg0, %c0_i32 : i32, i32
  }
}

</mosaic_0001>

<bundles_post_ra>
// kernel: tpu_custom_call.1
= control target key start
LH: loop header
LB: loop body
LE: loop exit
PB: predicated region body
PF: predicated region fallthrough
CT: control target
= control target key end

     0   :  { %s1717_s0 = inlined_call_operand.hbm [shape: f32[16,128], index: 0, kind: input, shape index: {}]   ;;  %s1718_s1 = inlined_call_operand.hbm [shape: f32[16,128], index: 1, kind: input, shape index: {}]   ;;  %s1719_s2 = inlined_call_operand.hbm [shape: bf16[128,128], index: 2, kind: input, shape index: {}]   ;;  %s1720_s3 = inlined_call_operand.vmem [shape: f32[1,128], index: 3, kind: input, shape index: {}]   ;;  %s1721_s4 = inlined_call_operand.hbm [shape: bf16[128,256], index: 4, kind: input, shape index: {}]   ;;  %s1722_s5 = inlined_call_operand.vmem [shape: f32[1,256], index: 5, kind: input, shape index: {}]   ;;  %s1723_s6 = inlined_call_operand.hbm [shape: f32[16,128], index: 6, kind: output, shape index: {0}]   ;;  %s1724_s7 = inlined_call_operand.hbm [shape: f32[16,128], index: 7, kind: output, shape index: {1}]   ;;  %s1725_s8 = inlined_call_operand.hbm [shape: f32[16,128], index: 8, kind: output, shape index: {2}]  }
   0x1   :  { %1734 = sst [smem:[#allocation23_spill]] %s1719_s2 }
   0x2   :  { %1735 = sst [smem:[#allocation24_spill]] %s1721_s4 }
   0x3   :  { %14 = vsyncpa [#allocation3], 0 }
   0x4   :  { %16 = vsyncpa [#allocation3 + $0x1], 0 }
   0x5   :  { %17 = vsyncpa [#allocation6], 0 }
   0x6   :  { %19 = vsyncpa [#allocation6 + $0x1], 0 }
   0x7   :  { %20 = vsyncpa [#allocation9], 0 }
   0x8   :  { %21 = vsyncpa [#allocation4], 0 }
   0x9   :  { %23 = vsyncpa [#allocation4 + $0x1], 0 }
   0xa   :  { %24 = vsyncpa [#allocation12], 0 }
   0xb   :  { %26 = vsyncpa [#allocation12 + $0x1], 0  ;;  %s1405_s27 = smov 0   ;;  %s1407_s28 = smov 0  }
   0xc   :  { %s1409_s29 = smov 0   ;;  %s1411_s30 = smov 0  }
   0xd LB: > { %1736 = sst [smem:[#allocation20_spill]] %s1340_s29  ;;  %s1426_s9 = sadd.s32 4294967295, %s1344_s30   ;;  %s1344_s30 = sphi %s1411_s30, %s1759_s30   ;;  %s1340_s29 = sphi %s1409_s29, %s1761_s29   ;;  %s1336_s28 = sphi %s1407_s28, %s1763_s28   ;;  %s1332_s27 = sphi %s1405_s27, %s1762_s27  }
   0xe   : > { %s1727_s10 = sadd.s32 4294967294, %s1344_s30   ;;  %p52_p0 = scmp.ne.s32.totalorder %s1336_s28, %s1332_s27 }
   0xf   : > { %p1726_p1 = scmp.eq.s32.totalorder %s1426_s9, 0  ;;  %p192_p3 = scmp.eq.s32.totalorder %s1727_s10, 1 }
  0x10   : > { %p903_p5 = scmp.ge.s32.totalorder %s1344_s30, 1  ;;  %p251_p7 = scmp.lt.s32.totalorder %s1344_s30, 3 }
  0x11   : > { %p1437_p4 = por %p1726_p1, %p52_p0  ;;  %p1442_p6 = por %p192_p3, %p52_p0 }
  0x12   : > { %p1447_p8 = pnand %p903_p5, %p251_p7  ;;  %s1346_s14 = smov [#allocation7]  }
  0x13   : > { %s1737_s11 = scalar_select %p1437_p4, 1, 0 }
  0x14   : > { %s1738_s12 = scalar_select %p1442_p6, 1, 0 }
  0x15   : > { %s1739_s13 = scalar_select %p1447_p8, 1, 0 }
  0x16   : > { %s263_s15 = sshll.u32 %s1346_s14, 4  ;;  %p999_p9 = pneg %p1447_p8  ;;  %s264_s15 = int_to_ptr.vmem [resolvable:$true] %s263_s15 }
  0x17   : > { %s1347_s17 = smov [#allocation8]   ;;  %s1115_s19 = scalar_lea.vmem %s264_s15, 1024 }
  0x18   : > { %p1456_p11 = pnand %p999_p9, %p1726_p1  ;;  %s279_s18 = sshll.u32 %s1347_s17, 4  ;;  %s280_s18 = int_to_ptr.vmem [resolvable:$true] %s279_s18 }
  0x19   : > { %p1116_p13 = scmp.ne.s32.totalorder %s264_s15, %s1115_s19  ;;  %p1123_p5 = scmp.lt.s32.totalorder %s264_s15, %s264_s15 }
  0x1a   : > { %p1106_p12 = pneg %p1456_p11  ;;  %p1124_p7 = scmp.lt.s32.totalorder %s1115_s19, %s1115_s19 }
  0x1c   : > { %p1118_p0 = pnand %p1116_p13, %p1106_p12  ;;  %p1125_p10 = por %p1124_p7, %p1123_p5 }
  0x1e   : > { %p1119_p3 = pneg %p1118_p0 }
  0x20   : > { %p1126_p9 = pnand %p1125_p10, %p1119_p3 }
  0x22   : > { %1129 = shalt.err (!%p1126_p9)
}
  0x23   : > { %s1348_s20 = smov 64   ;;  %s1349_s21 = smov 4  }
  0x24   : > { %s1741_s2 = sld [smem:[#allocation23_spill]]  ;;  %s1141_s24 = scalar_lea.vmem %s280_s18, 2048 }
  0x25   : > { %p1142_p1 = scmp.ne.s32.totalorder %s280_s18, %s1141_s24  ;;  %p1149_p2 = scmp.lt.s32.totalorder %s280_s18, %s280_s18 }
  0x26   : > { %p1150_p6 = scmp.lt.s32.totalorder %s1141_s24, %s1141_s24 }
  0x27   : > { %p1144_p13 = pnand %p1142_p1, %p1106_p12 }
  0x28   : > { %p1151_p5 = por %p1150_p6, %p1149_p2 }
  0x29   : > { %p1145_p0 = pneg %p1144_p13 }
  0x2a   : > { %1002 = dma.hbm_to_vmem [thread:$0]  (!%p1456_p11), %s1741_s2, 1024, %s264_s15, [#allocation6], %s1348_s20, %s1348_s20, %s1349_s21  }
  0x2b   : > { %p1152_p10 = pnand %p1151_p5, %p1145_p0 }
  0x2d   : > { %1155 = shalt.err (!%p1152_p10)
}
  0x2e   : > { %s1350_s25 = smov 128   ;;  %s1351_s26 = smov 8  }
  0x2f   : > { %s1742_s4 = sld [smem:[#allocation24_spill]]  ;;  %s1479_s17 = sadd.s32 1, %s1344_s30  }
  0x30   : > { %1743 = sst [smem:[#allocation21_spill]] %s1479_s17  ;;  %s36_s19 = ssub.s32 %s1344_s30, %s1479_s17 }
  0x31   : > { %p37_p1 = scmp.eq.s32.totalorder %s36_s19, 0  ;;  %s39_s20 = sadd.s32 1, %s1340_s29 }
  0x32   : > { %p46_p2 = scmp.ne.s32.totalorder %s1340_s29, %s1336_s28  ;;  %p47_p6 = scmp.eq.s32.totalorder %s1344_s30, 0 }
  0x33   : > { %s1488_s21 = scalar_select %p37_p1, %s1340_s29, %s39_s20  }
  0x34   : > { %p48_p12 = por %p47_p6, %p46_p2  ;;  %p1745_p3 = scmp.eq.s32.totalorder %s1426_s9, 1 }
  0x35   : > { %1005 = dma.hbm_to_vmem [thread:$0]  (!%p1456_p11), %s1742_s4, 2048, %s280_s18, [#allocation9], %s1350_s25, %s1350_s25, %s1351_s26  }
  0x36   : > { %1744 = sst [smem:[#allocation22_spill]] %s1488_s21  ;;  %p1492_p7 = por %p1745_p3, %p46_p2 }
  0x37   : > { %p1025_p9 = scmp.lt.s32.totalorder %s1344_s30, 2  ;;  %s296_s16 = sand.u32 1, %s1340_s29  }
  0x38   : > { %s1746_s22 = scalar_select %p1492_p7, 1, 0 }
  0x39   : > { %s1498_s18 = sshll.u32 %s296_s16, 3  ;;  %s908_s23 = sshll.u32 %s1344_s30, 7 }
  0x3a   : > { %s1504_s26 = scalar_lea.hbm %s1717_s0, %s908_s23  ;;  %s300_s14 = scalar_lea.vmem [#allocation2], %s1498_s18 }
  0x3b   : > { %s307_s15 = sshll.u32 %s300_s14, 4  ;;  %p1509_p11 = pnand %p1025_p9, %p48_p12  ;;  %s1507_s15 = int_to_ptr.vmem [resolvable:$true] %s307_s15 }
  0x3c   : > { %s1516_s2 = scalar_lea.hbm %s1718_s1, %s908_s23  ;;  %s314_s24 = sand.u32 1, %s1344_s30  }
  0x3d   : > { %s297_s25 = scalar_lea.sflag [#allocation3], %s296_s16  ;;  %s1156_s4 = scalar_lea.hbm %s1504_s26, 128 }
  0x3e   : > { %p1157_p13 = scmp.ne.s32.totalorder %s1504_s26, %s1156_s4  ;;  %p1158_p0 = pneg %p1509_p11 }
  0x3f   : > { %s1161_s29 = scalar_lea.hbm %s1717_s0, 256  ;;  %p1162_p1 = scmp.lt.s32.totalorder %s1504_s26, %s1717_s0 }
  0x40   : > { %p1159_p5 = pnand %p1158_p0, %p1157_p13  ;;  %p1163_p2 = scmp.lt.s32.totalorder %s1161_s29, %s1156_s4 }
  0x42   : > { %p1160_p10 = pneg %p1159_p5  ;;  %p1164_p6 = por %p1163_p2, %p1162_p1 }
  0x44   : > { %p1165_p12 = pnand %p1164_p6, %p1160_p10 }
  0x46   : > { %1168 = shalt.err (!%p1165_p12)
}
  0x47   : > { %s1169_s16 = scalar_lea.vmem %s1507_s15, 128  ;;  %s1352_s21 = smov [#allocation2]  }
  0x48   : > { %p1170_p3 = scmp.ne.s32.totalorder %s1507_s15, %s1169_s16  ;;  %s1174_s23 = sshll.u32 %s1352_s21, 4  ;;  %s1175_s23 = int_to_ptr.vmem [resolvable:$false] %s1174_s23 }
  0x49   : > { %s1176_s20 = scalar_lea.vmem %s1175_s23, 256  ;;  %p1177_p5 = scmp.lt.s32.totalorder %s1507_s15, %s1175_s23 }
  0x4a   : > { %p1172_p9 = pnand %p1170_p3, %p1158_p0  ;;  %p1178_p7 = scmp.lt.s32.totalorder %s1176_s20, %s1169_s16 }
  0x4c   : > { %p1173_p13 = pneg %p1172_p9  ;;  %p1179_p4 = por %p1178_p7, %p1177_p5 }
  0x4e   : > { %p1180_p1 = pnand %p1179_p4, %p1173_p13 }
  0x50   : > { %1183 = shalt.err (!%p1180_p1)
}
  0x51   : > { %1009 = dma.hbm_to_vmem [thread:$0]  (!%p1509_p11), %s1504_s26, 128, %s1507_s15, %s297_s25  }
  0x52   : > { %s318_s4 = scalar_lea.vmem [#allocation5], %s1498_s18  ;;  %s315_s17 = scalar_lea.sflag [#allocation6], %s314_s24 }
  0x53   : > { %s325_s29 = sshll.u32 %s318_s4, 4  ;;  %s1184_s14 = scalar_lea.hbm %s1516_s2, 128  ;;  %s326_s29 = int_to_ptr.vmem [resolvable:$true] %s325_s29 }
  0x54   : > { %p1185_p7 = scmp.ne.s32.totalorder %s1516_s2, %s1184_s14  ;;  %s1189_s21 = scalar_lea.hbm %s1718_s1, 256 }
  0x55   : > { %p1190_p2 = scmp.lt.s32.totalorder %s1516_s2, %s1718_s1  ;;  %p1191_p6 = scmp.lt.s32.totalorder %s1189_s21, %s1184_s14 }
  0x56   : > { %p1187_p4 = pnand %p1185_p7, %p1158_p0 }
  0x57   : > { %p1192_p12 = por %p1191_p6, %p1190_p2 }
  0x58   : > { %p1188_p10 = pneg %p1187_p4 }
  0x5a   : > { %p1193_p3 = pnand %p1192_p12, %p1188_p10 }
  0x5c   : > { %1196 = shalt.err (!%p1193_p3)
}
  0x5d   : > { %s1197_s18 = scalar_lea.vmem %s326_s29, 128  ;;  %s1353_s26 = smov [#allocation5]  }
  0x5e   : > { %p1198_p9 = scmp.ne.s32.totalorder %s326_s29, %s1197_s18  ;;  %s1202_s15 = sshll.u32 %s1353_s26, 4  ;;  %s1203_s15 = int_to_ptr.vmem [resolvable:$false] %s1202_s15 }
  0x5f   : > { %s1204_s24 = scalar_lea.vmem %s1203_s15, 256  ;;  %p1205_p1 = scmp.lt.s32.totalorder %s326_s29, %s1203_s15 }
  0x60   : > { %p1200_p13 = pnand %p1198_p9, %p1158_p0  ;;  %p1206_p7 = scmp.lt.s32.totalorder %s1204_s24, %s1197_s18 }
  0x62   : > { %p1201_p5 = pneg %p1200_p13  ;;  %p1207_p4 = por %p1206_p7, %p1205_p1 }
  0x64   : > { %p1208_p8 = pnand %p1207_p4, %p1201_p5 }
  0x66   : > { %1211 = shalt.err (!%p1208_p8)
}
  0x67   : > { %1012 = dma.hbm_to_vmem [thread:$0]  (!%p1509_p11), %s1516_s2, 128, %s326_s29, %s315_s17  }
  0x68   : > { %p1748_p10 = scmp.ne.s32.totalorder %s1739_s13, 0 }
  0x69   : > { %s1567_s25 = sand.u32 (!%p1748_p10), 1, %s1336_s28   ;;  %p1749_p0 = scmp.ne.s32.totalorder (!%p1748_p10), %s1737_s11, 0 }
  0x6a   : > { %334 = sbr.rel (%p1748_p10) target bundleno = 616 (0x268), region = 44  ;;  %s1570_s4 = sshll.u32 (!%p1748_p10), %s1567_s25, 3 }
  0x6b   : > { %s337_s14 = scalar_lea.sflag (!%p1748_p10), [#allocation3], %s1567_s25  ;;  %s340_s10 = scalar_lea.vmem (!%p1748_p10), [#allocation2], %s1570_s4 }
  0x6f   : > { %1307 = dma.done.wait (%p1749_p0), %s337_s14, 128  }
  0x70   : > { %1309 = vsyncadd (%p1749_p0), %s337_s14, 4294967168  ;;  %s345_s2 = sand.u32 1, %s1426_s9  }
  0x71   : > { %s346_s13 = scalar_lea.sflag [#allocation6], %s345_s2 }
  0x72   : > { %1311 = dma.done.wait (%p1749_p0), %s346_s13, 128  }
  0x73   : > { %1313 = vsyncadd (%p1749_p0), %s346_s13, 4294967168  ;;  %p1750_p8 = scmp.eq.s32.totalorder %s1426_s9, 0 }
  0x75   : > { %1315 = dma.done.wait (%p1750_p8), [#allocation6], 1024   ;;  %p1751_p11 = pmov %p1750_p8 }
  0x76   : > { %p1752_p2 = pmov %p1750_p8 }
  0x77   : > { %1317 = vsyncadd (%p1751_p11), [#allocation6], 4294966272 }
  0x78   : > { %1319 = dma.done.wait (%p1752_p2), [#allocation9], 2048   ;;  %p1753_p6 = pmov %p1752_p2 }
  0x79   : > { %v1354_v0 = vmov 0.0   ;;  %vm1355_vm0 = vmmov 0   ;;  %v1070_v1 = vld [vmem:[#allocation7 + $0x38] sm:$0xff]   ;;  %v1071_v2 = vld [vmem:[#allocation7 + $0x30] sm:$0xff]   ;;  %v1072_v3 = vld [vmem:[#allocation7 + $0x28] sm:$0xff]   ;;  %v1356_v27 = vmov 0   ;;  %v539_v36 = vlaneseq }
  0x7a   : > { %1321 = vsyncadd (%p1753_p6), [#allocation9], 4294965248  ;;  %961 = vmatprep.subr.bf16.mxu0 %v1354_v0  ;;  %977 = vmatprep.mubr.msk.bf16.mxu0 %vm1355_vm0, %v1354_v0  ;;  %v1078_v4 = vld [vmem:[#allocation8 + $0x74] ss:$8 sps:$4 sm:$0xff]   ;;  %v1080_v5 = vld [vmem:[#allocation8 + $0x70] ss:$8 sps:$4 sm:$0xff]  }
  0x7b   : > { %962 = vmatpush3.bf16.msra.mxu0 %v1070_v1  ;;  %v1073_v6 = vld [vmem:[#allocation7 + $0x20] sm:$0xff]   ;;  %629 = vmatprep.subr.bf16.mxu1 %v1078_v4  ;;  %v1084_v9 = vld [vmem:[#allocation8 + $0x54] ss:$8 sps:$4 sm:$0xff]   ;;  %v1086_v11 = vld [vmem:[#allocation8 + $0x50] ss:$8 sps:$4 sm:$0xff]   ;;  %v540_v37 = vshrl.u32 %v539_v36, 7 }
  0x7c   : > { %963 = vmatprep.subr.bf16.mxu0 %v1354_v0  ;;  %v1081_v7 = vld [vmem:[#allocation8 + $0x64] ss:$8 sps:$4 sm:$0xff]   ;;  %630 = vmatpush1.bf16.msra.mxu1 %v1080_v5  ;;  %v1083_v8 = vld [vmem:[#allocation8 + $0x60] ss:$8 sps:$4 sm:$0xff]   ;;  %v1074_v10 = vld [vmem:[#allocation7 + $0x18] sm:$0xff]   ;;  %s1603_s21 = sshll.u32 %s1426_s9, 7 }
  0x7d   : > { %631 = vmatprep.subr.bf16.mxu1 %v1081_v7  ;;  %v1087_v12 = vld [vmem:[#allocation8 + $0x44] ss:$8 sps:$4 sm:$0xff]   ;;  %v1075_v13 = vld [vmem:[#allocation7 + $0x10] sm:$0xff]   ;;  %v1089_v14 = vld [vmem:[#allocation8 + $0x40] ss:$8 sps:$4 sm:$0xff]   ;;  %661 = vmatprep.mubr.bf16.mxu1 %v1356_v27  ;;  %v541_v38 = vsub.s32 0, %v540_v37  ;;  %s1615_s14 = scalar_lea.hbm %s1723_s6, %s1603_s21  ;;  %s1624_s11 = scalar_lea.hbm %s1724_s7, %s1603_s21 }
  0x7e   : > { %v1090_v15 = vld [vmem:[#allocation8 + $0x34] ss:$8 sps:$4 sm:$0xff]   ;;  %v1076_v16 = vld [vmem:[#allocation7 + $0x8] sm:$0xff]   ;;  %v1092_v17 = vld [vmem:[#allocation8 + $0x30] ss:$8 sps:$4 sm:$0xff]   ;;  %v545_v40 = vsub.s32 1, %v540_v37 }
  0x7f   : > { %964 = vmatpush3.bf16.msra.mxu0 %v1071_v2  ;;  %v1093_v18 = vld [vmem:[#allocation8 + $0x24] ss:$8 sps:$4 sm:$0xff]   ;;  %v1095_v21 = vld [vmem:[#allocation8 + $0x20] ss:$8 sps:$4 sm:$0xff]   ;;  %v1096_v23 = vld [vmem:[#allocation8 + $0x14] ss:$8 sps:$4 sm:$0xff]  }
  0x80   : > { %965 = vmatprep.subr.bf16.mxu0 %v1354_v0  ;;  %632 = vmatpush1.bf16.msra.mxu1 %v1083_v8  ;;  %v1077_v19 = vld [vmem:[#allocation7] sm:$0xff]   ;;  %v1098_v24 = vld [vmem:[#allocation8 + $0x10] ss:$8 sps:$4 sm:$0xff]   ;;  %s390_s23 = scalar_lea.vmem [#allocation10], %s1570_s4  ;;  %s397_s18 = scalar_lea.vmem [#allocation11], %s1570_s4 }
  0x81   : > { %633 = vmatprep.subr.bf16.mxu1 %v1084_v9  ;;  %v406_v20 = vld [vmem:[%s340_s10] sm:$0xff]  ;;  %s703_s20 = sshll.u32 %s390_s23, 4  ;;  %s716_s26 = sshll.u32 %s397_s18, 4  ;;  %s1617_s20 = int_to_ptr.vmem [resolvable:$true] %s703_s20  ;;  %s1626_s26 = int_to_ptr.vmem [resolvable:$true] %s716_s26 }
  0x82   : > { %v407_v22 = vpack.c.bf16 %v406_v20, %v406_v20  ;;  %v1099_v25 = vld [vmem:[#allocation8 + $0x4] ss:$8 sps:$4 sm:$0xff]   ;;  %v1101_v26 = vld [vmem:[#allocation8] ss:$8 sps:$4 sm:$0xff]   ;;  %s680_s29 = scalar_lea.sflag [#allocation4], %s1567_s25  ;;  %s1212_s17 = scalar_lea.vmem %s1617_s20, 128 }
  0x83   : > { %966 = vmatpush3.bf16.msra.mxu0 %v1072_v3  ;;  %v919_v28 = vld [vmem:[%s1720_s3] ss:$0 sm:$0xff]  ;;  %p1213_p12 = scmp.ne.s32.totalorder %s1617_s20, %s1212_s17  ;;  %p1754_p3 = scmp.ne.s32.totalorder %s1746_s22, 0 }
  0x84   : > { %967 = vmatprep.subr.bf16.mxu0 %v1354_v0  ;;  %634 = vmatpush1.bf16.msra.mxu1 %v1086_v11  ;;  %v537_v39 = vld [vmem:[%s1722_s5] sm:$0x3]  ;;  %s1357_s16 = smov [#allocation10]  }
  0x85   : > { %635 = vmatprep.subr.bf16.mxu1 %v1087_v12  ;;  %v542_v41 = vrot.slane %v537_v39, %v541_v38  ;;  %v546_v42 = vrot.slane %v537_v39, %v545_v40  ;;  %p1214_p9 = pnand %p1213_p12, %p1754_p3  ;;  %s1216_s15 = sshll.u32 %s1357_s16, 4  ;;  %s1217_s15 = int_to_ptr.vmem [resolvable:$false] %s1216_s15 }
  0x86   : > { %s1218_s24 = scalar_lea.vmem %s1217_s15, 256  ;;  %p1219_p5 = scmp.lt.s32.totalorder %s1617_s20, %s1217_s15 }
  0x87   : > { %968 = vmatpush3.bf16.msra.mxu0 %v1073_v6  ;;  %p1215_p13 = pneg %p1214_p9  ;;  %p1220_p1 = scmp.lt.s32.totalorder %s1218_s24, %s1212_s17 }
  0x88   : > { %969 = vmatprep.subr.bf16.mxu0 %v1354_v0  ;;  %636 = vmatpush1.bf16.msra.mxu1 %v1089_v14 }
  0x89   : > { %637 = vmatprep.subr.bf16.mxu1 %v1090_v15  ;;  %p1221_p7 = por %p1220_p1, %p1219_p5 }
  0x8b   : > { %970 = vmatpush3.bf16.msra.mxu0 %v1074_v10  ;;  %p1222_p4 = pnand %p1221_p7, %p1215_p13 }
  0x8c   : > { %971 = vmatprep.subr.bf16.mxu0 %v1354_v0  ;;  %638 = vmatpush1.bf16.msra.mxu1 %v1092_v17 }
  0x8d   : > { %639 = vmatprep.subr.bf16.mxu1 %v1093_v18 }
  0x8f   : > { %972 = vmatpush3.bf16.msra.mxu0 %v1075_v13 }
  0x90   : > { %973 = vmatprep.subr.bf16.mxu0 %v1354_v0  ;;  %640 = vmatpush1.bf16.msra.mxu1 %v1095_v21 }
  0x91   : > { %641 = vmatprep.subr.bf16.mxu1 %v1096_v23 }
  0x93   : > { %974 = vmatpush3.bf16.msra.mxu0 %v1076_v16 }
  0x94   : > { %975 = vmatprep.subr.bf16.mxu0 %v1354_v0  ;;  %642 = vmatpush1.bf16.msra.mxu1 %v1098_v24 }
  0x95   : > { %643 = vmatprep.subr.bf16.mxu1 %v1099_v25 }
  0x97   : > { %976 = vmatpush3.bf16.msra.mxu0 %v1077_v19 }
  0x98   : > { %644 = vmatpush1.bf16.msra.mxu1 %v1101_v26 }
  0x9a   : > { %978 = vmatmul.mubr.bf16.vlgmr.msra.gmra.mxu0 %v407_v22 }
 0x15a   : > { %v513_v29 = vpop.f32.mrf.mxu0 }
 0x15b   : > { %v514_v30 = vadd.f32 %v919_v28, %v513_v29 }
 0x15c   : > { %v979_v31 = vpop.f32.mrf.mxu0 }
 0x15d   : > { %v519_v32 = vmax.f32 %v514_v30, 0.0 }
 0x15e   : > { %v516_v33 = vpop.f32.mrf.mxu0 }
 0x15f   : > { %v520_v34 = vpack.c.bf16 %v519_v32, %v519_v32 }
 0x160   : > { %v980_v35 = vpop.f32.mrf.mxu0 }
 0x161   : > { %662 = vmatmul.mubr.bf16.vlgmr.msra.gmra.mxu1 %v520_v34 }
 0x221   : > { %v663_v43 = vpop.f32.mrf.mxu1 }
 0x222   : > { %v1609_v44 = vadd.f32 %v663_v43, %v542_v41 }
 0x223   : > { %v665_v45 = vpop.f32.mrf.mxu1 }
 0x224   : > { %676 = vst [vmem:[%s390_s23] sm:$0xff] %v1609_v44  ;;  %v666_v46 = vadd.f32 %v665_v45, %v546_v42 }
 0x225   : > { %v667_v47 = vpop.f32.mrf.mxu1 }
 0x226   : > { %1225 = shalt.err (!%p1222_p4)
}
 0x227   : > { %s1226_s23 = scalar_lea.hbm %s1615_s14, 128  ;;  %s1230_s13 = scalar_lea.hbm %s1723_s6, 256 }
 0x228   : > { %p1227_p10 = scmp.ne.s32.totalorder %s1615_s14, %s1226_s23  ;;  %p1231_p11 = scmp.lt.s32.totalorder %s1615_s14, %s1723_s6 }
 0x229   : > { %p1232_p2 = scmp.lt.s32.totalorder %s1230_s13, %s1226_s23 }
 0x22a   : > { %p1228_p0 = pnand %p1227_p10, %p1754_p3 }
 0x22b   : > { %p1233_p6 = por %p1232_p2, %p1231_p11 }
 0x22c   : > { %p1229_p8 = pneg %p1228_p0 }
 0x22e   : > { %p1234_p12 = pnand %p1233_p6, %p1229_p8 }
 0x230   : > { %1237 = shalt.err (!%p1234_p12)
}
 0x231   : > { %993 = dma.vmem_to_hbm [thread:$0]  (%p1754_p3), %s1617_s20, 128, %s1615_s14, %s680_s29   ;;  %v670_v48 = vmul.f32 0.5, %v666_v46  ;;  %677 = vst [vmem:[%s397_s18] sm:$0xff] %v666_v46  ;;  %v668_v49 = vpop.f32.mrf.mxu1 }
 0x232   : > { %s1653_s19 = scalar_lea.sflag [#allocation12], %s345_s2  ;;  %s1238_s17 = scalar_lea.vmem %s1626_s26, 128 }
 0x233   : > { %p1239_p9 = scmp.ne.s32.totalorder %s1626_s26, %s1238_s17  ;;  %s1358_s15 = smov [#allocation11]  }
 0x234   : > { %s1242_s24 = sshll.u32 %s1358_s15, 4  ;;  %s1243_s24 = int_to_ptr.vmem [resolvable:$false] %s1242_s24 }
 0x235   : > { %p1240_p13 = pnand %p1239_p9, %p1754_p3  ;;  %s1244_s23 = scalar_lea.vmem %s1243_s24, 256 }
 0x236   : > { %p1245_p1 = scmp.lt.s32.totalorder %s1626_s26, %s1243_s24  ;;  %p1246_p7 = scmp.lt.s32.totalorder %s1244_s23, %s1238_s17 }
 0x237   : > { %p1241_p5 = pneg %p1240_p13 }
 0x238   : > { %p1247_p4 = por %p1246_p7, %p1245_p1 }
 0x23a   : > { %p1248_p10 = pnand %p1247_p4, %p1241_p5 }
 0x23c   : > { %1251 = shalt.err (!%p1248_p10)
}
 0x23d   : > { %s1252_s9 = scalar_lea.hbm %s1624_s11, 128  ;;  %s1256_s18 = scalar_lea.hbm %s1724_s7, 256 }
 0x23e   : > { %p1253_p0 = scmp.ne.s32.totalorder %s1624_s11, %s1252_s9  ;;  %p1257_p2 = scmp.lt.s32.totalorder %s1624_s11, %s1724_s7 }
 0x23f   : > { %p1258_p6 = scmp.lt.s32.totalorder %s1256_s18, %s1252_s9 }
 0x240   : > { %p1254_p8 = pnand %p1253_p0, %p1754_p3 }
 0x241   : > { %p1259_p12 = por %p1258_p6, %p1257_p2 }
 0x242   : > { %p1255_p11 = pneg %p1254_p8 }
 0x244   : > { %p1260_p9 = pnand %p1259_p12, %p1255_p11 }
 0x246   : > { %1263 = shalt.err (!%p1260_p9)
}
 0x247   : > { %994 = dma.vmem_to_hbm [thread:$0]  (%p1754_p3), %s1626_s26, 128, %s1624_s11, %s1653_s19   ;;  %v671_v50 = vmul.f32 1.442695, %v670_v48 }
 0x248   : > { %s1755_s25 = scalar_lea.vmem [#allocation5], %s1570_s4  ;;  %s404_s10 = scalar_lea.vmem [#allocation13], %s1570_s4 }
 0x249   : > { %1102 = vpow2.f32 %v671_v50  ;;  %v673_v51 = vld [vmem:[%s1755_s25] sm:$0xff]  ;;  %s729_s13 = sshll.u32 %s404_s10, 4  ;;  %s727_s15 = scalar_lea.hbm %s1725_s8, %s1603_s21  ;;  %s730_s13 = int_to_ptr.vmem [resolvable:$true] %s729_s13 }
 0x24a   : > { %s1264_s24 = scalar_lea.vmem %s730_s13, 128  ;;  %s1359_s26 = smov [#allocation13]  }
 0x24b   : > { %p1265_p13 = scmp.ne.s32.totalorder %s730_s13, %s1264_s24  ;;  %s1268_s11 = sshll.u32 %s1359_s26, 4  ;;  %s1269_s11 = int_to_ptr.vmem [resolvable:$false] %s1268_s11 }
 0x24c   : > { %s1270_s23 = scalar_lea.vmem %s1269_s11, 256  ;;  %p1271_p7 = scmp.lt.s32.totalorder %s730_s13, %s1269_s11 }
 0x24d   : > { %p1266_p5 = pnand %p1265_p13, %p1754_p3  ;;  %p1272_p4 = scmp.lt.s32.totalorder %s1270_s23, %s1264_s24 }
 0x24f   : > { %p1267_p1 = pneg %p1266_p5  ;;  %p1273_p10 = por %p1272_p4, %p1271_p7 }
 0x251   : > { %p1274_p0 = pnand %p1273_p10, %p1267_p1 }
 0x256   : > { %v1103_v52 = vpop.eup %1102 }
 0x257   : > { %v674_v53 = vmul.f32 %v1103_v52, %v673_v51 }
 0x259   : > { %v675_v54 = vadd.f32 %v674_v53, %v1609_v44 }
 0x25b   : > { %678 = vst [vmem:[%s404_s10] sm:$0xff] %v675_v54 }
 0x25c   : > { %1277 = shalt.err (!%p1274_p0)
}
 0x25d   : > { %s1278_s4 = scalar_lea.hbm %s727_s15, 128  ;;  %s1282_s2 = scalar_lea.hbm %s1725_s8, 256 }
 0x25e   : > { %p1279_p8 = scmp.ne.s32.totalorder %s727_s15, %s1278_s4  ;;  %p1283_p6 = scmp.lt.s32.totalorder %s727_s15, %s1725_s8 }
 0x25f   : > { %p1284_p12 = scmp.lt.s32.totalorder %s1282_s2, %s1278_s4 }
 0x260   : > { %p1280_p11 = pnand %p1279_p8, %p1754_p3 }
 0x261   : > { %p1285_p9 = por %p1284_p12, %p1283_p6 }
 0x262   : > { %p1281_p2 = pneg %p1280_p11 }
 0x264   : > { %p1286_p13 = pnand %p1285_p9, %p1281_p2 }
 0x266   : > { %1289 = shalt.err (!%p1286_p13)
}
 0x267   : > { %995 = dma.vmem_to_hbm [thread:$0]  (%p1754_p3), %s730_s13, 128, %s727_s15, %s1653_s19  }
 0x268 PF: > { %s741_s14 = sand.u32 1, %s1332_s27   ;;  %p1756_p5 = scmp.ne.s32.totalorder %s1738_s12, 0 }
 0x269   : > { %p1757_p1 = scmp.ge.s32.totalorder %s1344_s30, 2  ;;  %s742_s29 = scalar_lea.sflag [#allocation4], %s741_s14 }
 0x26b   : > { %p1014_p7 = pnand %p1757_p1, %p1756_p5 }
 0x26d   : > { %p1015_p4 = pneg %p1014_p7 }
 0x26f   : > { %1323 = dma.done.wait (%p1015_p4), %s742_s29, 128  }
 0x270   : > { %1325 = vsyncadd (%p1015_p4), %s742_s29, 4294967168  ;;  %s1758_s25 = sadd.s32 4294967294, %s1344_s30  }
 0x271   : > { %s750_s10 = sand.u32 1, %s1758_s25  }
 0x272   : > { %s751_s16 = scalar_lea.sflag [#allocation12], %s750_s10 }
 0x273   : > { %1327 = dma.done.wait (%p1015_p4), %s751_s16, 256  }
 0x274   : > { %1329 = vsyncadd (%p1015_p4), %s751_s16, 4294967040  ;;  %s1759_s30 = sld [smem:[#allocation21_spill]]  ;;  %s1762_s27 = smov %s1336_s28 }
 0x275   : > { %s1760_s22 = sld [smem:[#allocation20_spill]] }
 0x276   : > { %s1761_s29 = sld [smem:[#allocation22_spill]] }
 0x27a   : > { %p29_p3 = scmp.ge.s32.totalorder %s1759_s30, 4  }
 0x27b   : > { %s1763_s28 = smov %s1760_s22 }
 0x27c   :  { %31 = sbr.rel (!%p29_p3) target bundleno = 13 (0xd), region = 142 }
 0x281   :  { %765 = vsyncpa [#allocation3], 1 }
 0x282   :  { %767 = vsyncpa [#allocation3 + $0x1], 1 }
 0x283   :  { %768 = vsyncpa [#allocation6], 1 }
 0x284   :  { %770 = vsyncpa [#allocation6 + $0x1], 1 }
 0x285   :  { %771 = vsyncpa [#allocation9], 1 }
 0x286   :  { %772 = vsyncpa [#allocation4], 1 }
 0x287   :  { %774 = vsyncpa [#allocation4 + $0x1], 1 }
 0x288   :  { %775 = vsyncpa [#allocation12], 1 }
 0x289   :  { %777 = vsyncpa [#allocation12 + $0x1], 1 }

</bundles_post_ra>
